<compile_context>
chip_gen: v7x
topology: tpu7x:2x2x1
jax: 0.10.0
libtpu: 0.0.40
codegen_flags: <defaults>
</compile_context>

<pallas_src>
import functools

import numpy as np
import jax
import jax.numpy as jnp
from jax.experimental import pallas as pl
from jax.experimental.pallas import tpu as pltpu


_PAD_SENTINEL = 1e18  # padded rows/cols land astronomically far from real points


def _round_up(v, m):
    return ((v + m - 1) // m) * m


def _nsearch_kernel(r2_ref, x_ref, yt_ref, mask_ref, counts_ref, *, d_dim):
    # r2_ref    : (1, 1)  f32 SMEM   radius^2 (runtime scalar -> no recompile per radius)
    # x_ref     : (tm, D) f32        query tile (row-major; (tm,1) columns w/o transpose)
    # yt_ref    : (D, tn) f32        data tile, coordinate-major (lane-dense rows)
    # mask_ref  : (tm, tn) int8      within-radius mask
    # counts_ref: (tm, 128) int32    per-query counts, resident across the j axis
    j = pl.program_id(1)

    @pl.when(j == 0)
    def _():
        counts_ref[...] = jnp.zeros_like(counts_ref)

    r2 = r2_ref[0, 0]
    x = x_ref[...]
    acc = None
    for d in range(d_dim):                       # D is tiny (e.g. 3): static unroll
        xd = x[:, d:d + 1]                       # (tm, 1)
        yd = yt_ref[d:d + 1, :]                  # (1, tn)
        diff = xd - yd                           # VPU broadcast -> (tm, tn)
        sq = diff * diff
        acc = sq if acc is None else acc + sq
    within = acc <= r2                           # (tm, tn) bool
    mask_ref[...] = within.astype(jnp.int8)

    # Cross-lane row reduce lands on the otherwise-idle XLU (free in this
    # VALU-bound kernel); accumulating into a j-resident block removes the
    # separate XLA reduction that would re-read the whole M*N mask from HBM.
    cnt = jnp.sum(within.astype(jnp.int32), axis=1, keepdims=True)   # (tm, 1)
    counts_ref[...] += cnt                        # broadcast over the 128 lanes


@functools.partial(jax.jit, static_argnames=("tm", "tn"))
def _radius_search_device(x, y, radius_sq, *, tm=512, tn=2048):
    """Tiled fixed-radius search.

    Returns:
      packed : (Mp, Np // 8) uint8  bit-packed within-radius mask
               (little-endian along the data axis; padded rows/cols are 0).
      counts : (M,) int32           per-query neighbor counts.
    """
    x = jnp.asarray(x, jnp.float32)
    y = jnp.asarray(y, jnp.float32)
    M, D = x.shape
    N, Dy = y.shape
    assert D == Dy

    # Tile selection: large tiles so per-step VALU work >> grid-step overhead;
    # tm multiple of 32 (int8 sublane tiling), tn multiple of 128 (lane-dense
    # unmasked stores); clamped for small inputs.
    tm = min(tm, _round_up(M, 32))
    # Keep >= 2 query-row blocks when possible so the "parallel" i axis can be
    # sharded across both TensorCores on v7x.
    if M > 32 and _round_up(M, tm) // tm < 2:
        tm = _round_up(-(-M // 2), 32)
    tn = min(tn, _round_up(N, 128))
    Mp = _round_up(M, tm)
    Np = _round_up(N, tn)

    # Sentinel padding: padded query rows / data columns can never be within
    # radius of real points -> no in-kernel boundary masking and no device-side
    # [:M, :N] slice/copy pass over the dense mask.
    x_p = jnp.pad(x, ((0, Mp - M), (0, 0)), constant_values=_PAD_SENTINEL)
    yt_p = jnp.pad(y.T, ((0, 0), (0, Np - N)), constant_values=_PAD_SENTINEL)
    r2 = jnp.full((1, 1), radius_sq, jnp.float32)

    kernel = functools.partial(_nsearch_kernel, d_dim=D)
    mask_p, counts_p = pl.pallas_call(
        kernel,
        out_shape=(jax.ShapeDtypeStruct((Mp, Np), jnp.int8),
                   jax.ShapeDtypeStruct((Mp, 128), jnp.int32)),
        grid=(Mp // tm, Np // tn),
        in_specs=[
            pl.BlockSpec(memory_space=pltpu.MemorySpace.SMEM),   # radius^2 scalar
            pl.BlockSpec((tm, D), lambda i, j: (i, 0)),          # queries (fixed over j)
            pl.BlockSpec((D, tn), lambda i, j: (0, j)),          # data, lane-dense tiles
        ],
        out_specs=(
            pl.BlockSpec((tm, tn), lambda i, j: (i, j)),         # mask tile
            pl.BlockSpec((tm, 128), lambda i, j: (i, 0)),        # counts (resident over j)
        ),
        compiler_params=pltpu.CompilerParams(
            dimension_semantics=("parallel", "arbitrary"),
            vmem_limit_bytes=32 * 1024 * 1024),
    )(r2, x_p, yt_p)

    # Bit-pack 8 data points per byte before leaving the device: 8x fewer
    # D2H (PCIe) bytes for the dense mask, which dominates for real clouds.
    weights = jnp.asarray([1, 2, 4, 8, 16, 32, 64, 128], jnp.int32)
    packed = jnp.sum(
        mask_p.astype(jnp.int32).reshape(Mp, Np // 8, 8) * weights,
        axis=-1).astype(jnp.uint8)

    counts = counts_p[:M, 0]
    return packed, counts


def neighbor_search(y, radius, x=None):
    """Forward pass of NeighborSearch.

    Returns (neighbors_index, neighbors_row_splits, neighbors_distance),
    mirroring open3d.ml.torch.layers.FixedRadiusSearch's default output
    (return_distances=False).
    """
    if x is None:
        x = y
    x = jnp.asarray(x, jnp.float32)
    y = jnp.asarray(y, jnp.float32)
    M = x.shape[0]

    packed, counts = _radius_search_device(x, y, float(radius) ** 2)

    packed_np = np.asarray(jax.device_get(packed))                   # (Mp, Np//8)
    counts_np = np.asarray(jax.device_get(counts)).astype(np.int64)  # (M,)

    # CSR offsets: cumsum in int64 so totals above 2^31-1 do not overflow.
    row_splits = np.concatenate(
        [np.zeros((1,), np.int64), np.cumsum(counts_np, dtype=np.int64)])

    # Variable-length neighbor-list flattening (dynamic shape) stays on host.
    # TODO(synk): dynamic-length CSR output has no static-shape Pallas form.
    mask_np = np.unpackbits(packed_np, axis=1, bitorder="little")    # (Mp, Np)
    # Padded data columns are guaranteed 0 by the sentinel padding; padded
    # query rows are dropped by the [:M] row view (free, contiguous).
    _, cols = np.nonzero(mask_np[:M])        # row-major => ascending per query
    neighbors_index = cols.astype(np.int32)
    neighbors_distance = np.zeros((0,), np.float32)  # return_distances=False
    return neighbors_index, row_splits, neighbors_distance


if __name__ == "__main__":
    key = jax.random.PRNGKey(0)
    kx, ky = jax.random.split(key)
    M, N, D = 200, 176, 3            # non-multiples exercise padding / tile clamps
    radius = 0.25
    y_pts = jax.random.uniform(ky, (N, D), dtype=jnp.float32)
    x_pts = jax.random.uniform(kx, (M, D), dtype=jnp.float32)

    # Run the Pallas kernel once and block on it.
    packed, counts = _radius_search_device(x_pts, y_pts, float(radius) ** 2)
    packed, counts = jax.block_until_ready((packed, counts))

    # Reference: direct per-coordinate squared-distance (same formulation).
    xn = np.asarray(x_pts, np.float32)
    yn = np.asarray(y_pts, np.float32)
    diff = xn[:, None, :] - yn[None, :, :]
    d2_ref = np.sum(diff * diff, axis=-1, dtype=np.float32)
    r2_ref = np.float32(radius * radius)
    ref_mask = (d2_ref <= r2_ref).astype(np.int8)
    near_boundary = np.abs(d2_ref - r2_ref) < 1e-6

    mask_rec = np.unpackbits(np.asarray(packed), axis=1,
                             bitorder="little")[:M, :N].astype(np.int8)
    mism = mask_rec != ref_mask
    assert not np.any(mism & ~near_boundary), "radius mask mismatch"
    cnt_np = np.asarray(counts)
    assert (np.array_equal(cnt_np, ref_mask.astype(np.int64).sum(axis=1))
            or np.any(near_boundary)), "per-query count mismatch"

    # Full forward (x given explicitly).
    idx, splits, dists = neighbor_search(y_pts, radius, x=x_pts)
    assert splits.shape == (M + 1,)
    assert splits.dtype == np.int64
    assert splits[-1] == idx.shape[0]
    assert dists.shape == (0,)
    if not np.any(near_boundary):
        _, ref_cols = np.nonzero(ref_mask)
        assert np.array_equal(idx, ref_cols.astype(np.int32))
        assert np.array_equal(np.diff(splits), ref_mask.astype(np.int64).sum(axis=1))

    # Self-search (x defaults to y): every point is its own neighbor.
    idx_s, splits_s, _ = neighbor_search(y_pts, radius)
    assert splits_s.shape == (N + 1,)
    assert np.all(np.diff(splits_s) >= 1)
    assert splits_s[-1] == idx_s.shape[0]

    print("KERNEL_OK")
</pallas_src>

<mosaic_0001>
module attributes {stable_mosaic.version = 11 : i64} {
  func.func @_nsearch_kernel(%arg0: i32, %arg1: i32, %arg2: memref<1x1xf32, #tpu.memory_space<smem>>, %arg3: memref<128x3xf32, #tpu.memory_space<vmem>>, %arg4: memref<3x256xf32, #tpu.memory_space<vmem>>, %arg5: memref<128x256xi8, #tpu.memory_space<vmem>>, %arg6: memref<128x128xi32, #tpu.memory_space<vmem>>) attributes {dimension_semantics = [#tpu.dimension_semantics<parallel>, #tpu.dimension_semantics<arbitrary>], iteration_bounds = array<i64: 2, 1>, scalar_prefetch = 0 : i64, scratch_operands = 0 : i64, tpu.core_type = #tpu.core_type<tc>, window_params = [{transform_indices = @transform_0, window_bounds = array<i64: 1, 1>}, {transform_indices = @transform_1, window_bounds = array<i64: 128, 3>}, {transform_indices = @transform_2, window_bounds = array<i64: 3, 256>}, {transform_indices = @transform_3, window_bounds = array<i64: 128, 256>}, {transform_indices = @transform_4, window_bounds = array<i64: 128, 128>}]} {
    %c0_i32 = arith.constant 0 : i32
    %0 = arith.cmpi eq, %arg1, %c0_i32 : i32
    %1 = arith.extui %0 : i1 to i32
    %c0_i32_0 = arith.constant 0 : i32
    %2 = arith.cmpi ne, %1, %c0_i32_0 : i32
    scf.if %2 {
      %c0_i32_14 = arith.constant 0 : i32
      %36 = vector.broadcast %c0_i32_14 : i32 to vector<128x128xi32>
      %c0_15 = arith.constant 0 : index
      %c0_16 = arith.constant 0 : index
      %37 = vector.load %arg6[%c0_15, %c0_16] : memref<128x128xi32, #tpu.memory_space<vmem>>, vector<128x128xi32>
      tpu.vector_store %arg6[%c0_15, %c0_16], %36 {strides = array<i32>} : memref<128x128xi32, #tpu.memory_space<vmem>>, vector<128x128xi32>,
    } else {
    }
    %c0 = arith.constant 0 : index
    %c0_1 = arith.constant 0 : index
    %3 = memref.load %arg2[%c0, %c0_1] : memref<1x1xf32, #tpu.memory_space<smem>>
    %c0_2 = arith.constant 0 : index
    %c0_3 = arith.constant 0 : index
    %4 = vector.load %arg3[%c0_2, %c0_3] : memref<128x3xf32, #tpu.memory_space<vmem>>, vector<128x3xf32>
    %5 = vector.extract_strided_slice %4 {offsets = [0, 0], sizes = [128, 1], strides = [1, 1]} : vector<128x3xf32> to vector<128x1xf32>
    %c0_4 = arith.constant 0 : index
    %c0_5 = arith.constant 0 : index
    %6 = vector.load %arg4[%c0_4, %c0_5] : memref<3x256xf32, #tpu.memory_space<vmem>>, vector<1x256xf32>
    %7 = vector.broadcast %5 : vector<128x1xf32> to vector<128x256xf32>
    %8 = vector.broadcast %6 : vector<1x256xf32> to vector<128x256xf32>
    %9 = arith.subf %7, %8 : vector<128x256xf32>
    %10 = arith.mulf %9, %9 : vector<128x256xf32>
    %11 = vector.extract_strided_slice %4 {offsets = [0, 1], sizes = [128, 1], strides = [1, 1]} : vector<128x3xf32> to vector<128x1xf32>
    %c1 = arith.constant 1 : index
    %c0_6 = arith.constant 0 : index
    %12 = vector.load %arg4[%c1, %c0_6] : memref<3x256xf32, #tpu.memory_space<vmem>>, vector<1x256xf32>
    %13 = vector.broadcast %11 : vector<128x1xf32> to vector<128x256xf32>
    %14 = vector.broadcast %12 : vector<1x256xf32> to vector<128x256xf32>
    %15 = arith.subf %13, %14 : vector<128x256xf32>
    %16 = arith.mulf %15, %15 : vector<128x256xf32>
    %17 = arith.addf %10, %16 : vector<128x256xf32>
    %18 = vector.extract_strided_slice %4 {offsets = [0, 2], sizes = [128, 1], strides = [1, 1]} : vector<128x3xf32> to vector<128x1xf32>
    %c2 = arith.constant 2 : index
    %c0_7 = arith.constant 0 : index
    %19 = vector.load %arg4[%c2, %c0_7] : memref<3x256xf32, #tpu.memory_space<vmem>>, vector<1x256xf32>
    %20 = vector.broadcast %18 : vector<128x1xf32> to vector<128x256xf32>
    %21 = vector.broadcast %19 : vector<1x256xf32> to vector<128x256xf32>
    %22 = arith.subf %20, %21 : vector<128x256xf32>
    %23 = arith.mulf %22, %22 : vector<128x256xf32>
    %24 = arith.addf %17, %23 : vector<128x256xf32>
    %25 = vector.broadcast %3 : f32 to vector<128x256xf32>
    %26 = arith.cmpf ole, %24, %25 : vector<128x256xf32>
    %27 = arith.extui %26 : vector<128x256xi1> to vector<128x256xi8>
    %c0_8 = arith.constant 0 : index
    %c0_9 = arith.constant 0 : index
    %28 = vector.load %arg5[%c0_8, %c0_9] : memref<128x256xi8, #tpu.memory_space<vmem>>, vector<128x256xi8>
    tpu.vector_store %arg5[%c0_8, %c0_9], %27 {strides = array<i32>} : memref<128x256xi8, #tpu.memory_space<vmem>>, vector<128x256xi8>,
    %29 = arith.extui %26 : vector<128x256xi1> to vector<128x256xi32>
    %cst = arith.constant dense<0> : vector<128xi32>
    %30 = vector.multi_reduction <add>, %29, %cst [1] : vector<128x256xi32> to vector<128xi32>
    %31 = vector.shape_cast %30 : vector<128xi32> to vector<128x1xi32>
    %c0_10 = arith.constant 0 : index
    %c0_11 = arith.constant 0 : index
    %32 = vector.load %arg6[%c0_10, %c0_11] : memref<128x128xi32, #tpu.memory_space<vmem>>, vector<128x128xi32>
    %33 = vector.broadcast %31 : vector<128x1xi32> to vector<128x128xi32>
    %34 = arith.addi %32, %33 : vector<128x128xi32>
    %c0_12 = arith.constant 0 : index
    %c0_13 = arith.constant 0 : index
    %35 = vector.load %arg6[%c0_12, %c0_13] : memref<128x128xi32, #tpu.memory_space<vmem>>, vector<128x128xi32>
    tpu.vector_store %arg6[%c0_12, %c0_13], %34 {strides = array<i32>} : memref<128x128xi32, #tpu.memory_space<vmem>>, vector<128x128xi32>,
    return
  }
  func.func @transform_0(%arg0: i32, %arg1: i32) -> (i32, i32) {
    %c0_i32 = arith.constant 0 : i32
    %c0_i32_0 = arith.constant 0 : i32
    %c0_i32_1 = arith.constant 0 : i32
    return %c0_i32, %c0_i32_0 : i32, i32
  }
  func.func @transform_1(%arg0: i32, %arg1: i32) -> (i32, i32) {
    %c0_i32 = arith.constant 0 : i32
    %c0_i32_0 = arith.constant 0 : i32
    return %arg0, %c0_i32 : i32, i32
  }
  func.func @transform_2(%arg0: i32, %arg1: i32) -> (i32, i32) {
    %c0_i32 = arith.constant 0 : i32
    %c0_i32_0 = arith.constant 0 : i32
    return %c0_i32, %arg1 : i32, i32
  }
  func.func @transform_3(%arg0: i32, %arg1: i32) -> (i32, i32) {
    %c0_i32 = arith.constant 0 : i32
    return %arg0, %arg1 : i32, i32
  }
  func.func @transform_4(%arg0: i32, %arg1: i32) -> (i32, i32) {
    %c0_i32 = arith.constant 0 : i32
    %c0_i32_0 = arith.constant 0 : i32
    return %arg0, %c0_i32 : i32, i32
  }
}

</mosaic_0001>

<bundles_post_ra>
// kernel: _radius_search_device.1
= control target key start
LH: loop header
LB: loop body
LE: loop exit
PB: predicated region body
PF: predicated region fallthrough
CT: control target
= control target key end

     0   :  { %s1476_s17 = smov 0   ;;  %s1478_s18 = smov 0   ;;  %s2295_s0 = inlined_call_operand.<no memory space> [shape: f32[1,1], index: 0, kind: input, shape index: {}]   ;;  %s2296_s1 = inlined_call_operand.vmem [shape: f32[256,3], index: 1, kind: input, shape index: {}]   ;;  %s2297_s2 = inlined_call_operand.vmem [shape: f32[3,256], index: 2, kind: input, shape index: {}]   ;;  %s2298_s3 = inlined_call_operand.vmem [shape: s8[256,256], index: 3, kind: output, shape index: {0}]   ;;  %s2299_s4 = inlined_call_operand.vmem [shape: s32[256,128], index: 4, kind: output, shape index: {1}]  }
   0x1   :  { %10 = sst [smem:[#allocation2]] %s2295_s0  ;;  %s1480_s19 = smov 0  }
   0x2 LB: > { %s28_s0 = sadd.s32 1, %s1439_s18  ;;  %p1375_p0 = scmp.ge.s32.totalorder %s1443_s19, 1  ;;  %s1443_s19 = sphi %s1480_s19, %s16_s19   ;;  %s1439_s18 = sphi %s1478_s18, %s2333_s18   ;;  %s1435_s17 = sphi %s1476_s17, %s2332_s17  }
   0x3   : > { %p30_p1 = scmp.ge.s32.totalorder %s28_s0, 2  ;;  %p192_p2 = scmp.lt.s32.totalorder %s1443_s19, 3 }
   0x5   : > { %s2335_s0 = smov (%p30_p1, %s28_s0), 0  ;;  %p193_p3 = pnand %p1375_p0, %p192_p2 }
   0x7   : > { %196 = sbr.rel (%p193_p3) target bundleno = 469 (0x1d5), region = 32 }
   0xe   : > { %s1376_s20 = sshll.u32 %s1435_s17, 4  ;;  %v2300_v0 = vmov 0   ;;  %v1446_v17 = vmov 1   ;;  %v1447_v18 = vmov 2   ;;  %v384_v25 = vlaneseq  ;;  %s285_s27 = sld [smem:[#allocation2]] }
   0xf   : > { %1416 = vset.pattern.permute.xlu1 %v2300_v0  ;;  %1415 = vset.pattern.permute.xlu0 %v2300_v0  ;;  %p234_p4 = scmp.lt.s32.totalorder %s1376_s20, 31  ;;  %v302_v35 = vld [vmem:[%s2297_s2] ss:$4 sm:$0x3] }
  0x10   : > { %v385_v28 = vshrl.u32 %v384_v25, 7  ;;  %v1383_v40 = vld [vmem:[%s2297_s2 + $0x1] ss:$4 sm:$0x3] }
  0x11   : > { %s2337_s20 = smov (!%p234_p4, %s1376_s20), 31  ;;  %v1384_v48 = vld [vmem:[%s2297_s2 + $0x2] ss:$4 sm:$0x3] }
  0x12   : > { %s1377_s21 = sshll.u32 %s2337_s20, 3  ;;  %v386_v31 = vsub.s32 0, %v385_v28  ;;  %v390_v32 = vsub.s32 1, %v385_v28  ;;  %s1387_s6 = sshll.u32 %s2337_s20, 2 }
  0x13   : > { %s237_s24 = scalar_lea.vmem %s2296_s1, %s1377_s21  ;;  %s1978_s9 = scalar_lea.vmem %s2298_s3, %s1387_s6 }
  0x14   : > { %v288_v1 = vld [vmem:[%s237_s24 + $0x10] sm:$0xff]  ;;  %v286_v2 = vld [vmem:[%s237_s24] sm:$0xff]  ;;  %v289_v3 = vld [vmem:[%s237_s24 + $0x18] sm:$0xff]  ;;  %v1507_v36 = vrot.slane %v302_v35, %v386_v31  ;;  %v1509_v37 = vrot.slane %v302_v35, %v390_v32  ;;  %v1514_v41 = vrot.slane %v1383_v40, %v386_v31  ;;  %v1535_v57 = vrot.slane %v1383_v40, %v390_v32  ;;  %s2260_s12 = scalar_lea.vmem %s2299_s4, %s1377_s21 }
  0x15   : > { %315 = vperm.xlu1 %1416, %v288_v1   ;;  %305 = vperm.xlu0 %1415, %v286_v2   ;;  %v287_v4 = vld [vmem:[%s237_s24 + $0x8] sm:$0xff]  ;;  %v290_v6 = vld [vmem:[%s237_s24 + $0x20] sm:$0xff]  ;;  %v293_v7 = vld [vmem:[%s237_s24 + $0x38] sm:$0xff]  ;;  %v1537_v58 = vrot.slane %v1384_v48, %v386_v31  ;;  %v1539_v59 = vrot.slane %v1384_v48, %v390_v32  ;;  %v1541_v60 = vstv %s285_s27 }
  0x16   : > { %v291_v5 = vld [vmem:[%s237_s24 + $0x28] sm:$0xff]  ;;  %v292_v8 = vld [vmem:[%s237_s24 + $0x30] sm:$0xff]  ;;  %v294_v10 = vld [vmem:[%s237_s24 + $0x40] sm:$0xff]  ;;  %2307 = vst [vmem:[#allocation5_spill] sm:$0xff] %v1541_v60 }
  0x17   : > { %v295_v9 = vld [vmem:[%s237_s24 + $0x48] sm:$0xff]  ;;  %v297_v11 = vld [vmem:[%s237_s24 + $0x58] sm:$0xff]  ;;  %v296_v12 = vld [vmem:[%s237_s24 + $0x50] sm:$0xff]  ;;  %2305 = vst [vmem:[#allocation3_spill] sm:$0xff] %v1537_v58 }
  0x18   : > { %v299_v13 = vld [vmem:[%s237_s24 + $0x68] sm:$0xff]  ;;  %v298_v14 = vld [vmem:[%s237_s24 + $0x60] sm:$0xff]  ;;  %v301_v15 = vld [vmem:[%s237_s24 + $0x78] sm:$0xff]  ;;  %2306 = vst [vmem:[#allocation4_spill] sm:$0xff] %v1539_v59 }
  0x19   : > { %320 = vperm.xlu1 %1416, %v289_v3   ;;  %310 = vperm.xlu0 %1415, %v287_v4   ;;  %v300_v16 = vld [vmem:[%s237_s24 + $0x70] sm:$0xff] }
  0x1d   : > { %330 = vperm.xlu1 %1416, %v291_v5   ;;  %325 = vperm.xlu0 %1415, %v290_v6  }
  0x21   : > { %340 = vperm.xlu1 %1416, %v293_v7   ;;  %335 = vperm.xlu0 %1415, %v292_v8  }
  0x25   : > { %350 = vperm.xlu1 %1416, %v295_v9   ;;  %345 = vperm.xlu0 %1415, %v294_v10  }
  0x29   : > { %360 = vperm.xlu1 %1416, %v297_v11   ;;  %355 = vperm.xlu0 %1415, %v296_v12  }
  0x2d   : > { %370 = vperm.xlu1 %1416, %v299_v13   ;;  %365 = vperm.xlu0 %1415, %v298_v14  }
  0x31   : > { %380 = vperm.xlu1 %1416, %v301_v15   ;;  %375 = vperm.xlu0 %1415, %v300_v16  }
  0x35   : > { %1418 = vset.pattern.permute.xlu1 %v1446_v17  ;;  %1417 = vset.pattern.permute.xlu0 %v1446_v17 }
  0x36   : > { %465 = vperm.xlu1 %1418, %v287_v4   ;;  %461 = vperm.xlu0 %1417, %v286_v2  }
  0x3a   : > { %469 = vperm.xlu1 %1418, %v288_v1   ;;  %473 = vperm.xlu0 %1417, %v289_v3  }
  0x3e   : > { %477 = vperm.xlu1 %1418, %v290_v6   ;;  %481 = vperm.xlu0 %1417, %v291_v5  }
  0x42   : > { %485 = vperm.xlu1 %1418, %v292_v8   ;;  %489 = vperm.xlu0 %1417, %v293_v7  }
  0x46   : > { %493 = vperm.xlu1 %1418, %v294_v10   ;;  %497 = vperm.xlu0 %1417, %v295_v9  }
  0x4a   : > { %501 = vperm.xlu1 %1418, %v296_v12   ;;  %505 = vperm.xlu0 %1417, %v297_v11  }
  0x4e   : > { %509 = vperm.xlu1 %1418, %v298_v14   ;;  %513 = vperm.xlu0 %1417, %v299_v13  }
  0x52   : > { %517 = vperm.xlu1 %1418, %v300_v16   ;;  %521 = vperm.xlu0 %1417, %v301_v15  }
  0x56   : > { %1419 = vset.pattern.permute.xlu1 %v1447_v18  ;;  %1420 = vset.pattern.permute.xlu0 %v1447_v18 }
  0x57   : > { %634 = vperm.xlu1 %1419, %v286_v2   ;;  %638 = vperm.xlu0 %1420, %v287_v4  }
  0x5b   : > { %642 = vperm.xlu1 %1419, %v288_v1   ;;  %650 = vperm.xlu0 %1420, %v290_v6  }
  0x5f   : > { %646 = vperm.xlu1 %1419, %v289_v3   ;;  %658 = vperm.xlu0 %1420, %v292_v8  }
  0x63   : > { %654 = vperm.xlu1 %1419, %v291_v5   ;;  %666 = vperm.xlu0 %1420, %v294_v10  }
  0x67   : > { %662 = vperm.xlu1 %1419, %v293_v7   ;;  %674 = vperm.xlu0 %1420, %v296_v12  }
  0x6b   : > { %670 = vperm.xlu1 %1419, %v295_v9   ;;  %682 = vperm.xlu0 %1420, %v298_v14  }
  0x6f   : > { %678 = vperm.xlu1 %1419, %v297_v11   ;;  %690 = vperm.xlu0 %1420, %v300_v16  }
  0x73   : > { %686 = vperm.xlu1 %1419, %v299_v13  }
  0x77   : > { %694 = vperm.xlu1 %1419, %v301_v15  }
  0x94   : > { %v316_v19 = vpop.permute.xlu1 %315  ;;  %v306_v20 = vpop.permute.xlu0 %305 }
  0x95   : > { %v398_v42 = vsub.f32 %v316_v19, %v1507_v36  ;;  %v399_v43 = vsub.f32 %v316_v19, %v1509_v37  ;;  %v394_v44 = vsub.f32 %v306_v20, %v1507_v36  ;;  %v395_v45 = vsub.f32 %v306_v20, %v1509_v37 }
  0x97   : > { %v1543_v61 = vmul.f32 %v398_v42, %v398_v42  ;;  %v1545_v62 = vmul.f32 %v399_v43, %v399_v43  ;;  %v1547_v63 = vmul.f32 %v394_v44, %v394_v44  ;;  %v1549_v1 = vmul.f32 %v395_v45, %v395_v45 }
  0x98   : > { %v321_v21 = vpop.permute.xlu1 %320  ;;  %v311_v22 = vpop.permute.xlu0 %310 }
  0x99   : > { %v400_v49 = vsub.f32 %v321_v21, %v1507_v36  ;;  %v401_v50 = vsub.f32 %v321_v21, %v1509_v37  ;;  %v396_v51 = vsub.f32 %v311_v22, %v1507_v36  ;;  %v397_v52 = vsub.f32 %v311_v22, %v1509_v37 }
  0x9b   : > { %v1551_v2 = vmul.f32 %v400_v49, %v400_v49  ;;  %v1553_v3 = vmul.f32 %v401_v50, %v401_v50  ;;  %v1555_v4 = vmul.f32 %v396_v51, %v396_v51  ;;  %v1557_v5 = vmul.f32 %v397_v52, %v397_v52 }
  0x9c   : > { %v331_v23 = vpop.permute.xlu1 %330  ;;  %v326_v24 = vpop.permute.xlu0 %325 }
  0x9d   : > { %v404_v53 = vsub.f32 %v331_v23, %v1507_v36  ;;  %v405_v54 = vsub.f32 %v331_v23, %v1509_v37  ;;  %v402_v55 = vsub.f32 %v326_v24, %v1507_v36  ;;  %v403_v56 = vsub.f32 %v326_v24, %v1509_v37 }
  0x9f   : > { %v1559_v8 = vmul.f32 %v404_v53, %v404_v53  ;;  %v1561_v9 = vmul.f32 %v405_v54, %v405_v54  ;;  %v1563_v10 = vmul.f32 %v402_v55, %v402_v55  ;;  %v1565_v11 = vmul.f32 %v403_v56, %v403_v56 }
  0xa0   : > { %v341_v26 = vpop.permute.xlu1 %340  ;;  %v336_v27 = vpop.permute.xlu0 %335 }
  0xa1   : > { %v408_v12 = vsub.f32 %v341_v26, %v1507_v36  ;;  %v409_v13 = vsub.f32 %v341_v26, %v1509_v37  ;;  %v406_v14 = vsub.f32 %v336_v27, %v1507_v36  ;;  %v407_v15 = vsub.f32 %v336_v27, %v1509_v37 }
  0xa3   : > { %v1583_v31 = vmul.f32 %v408_v12, %v408_v12  ;;  %v1587_v32 = vmul.f32 %v406_v14, %v406_v14 }
  0xa4   : > { %v351_v29 = vpop.permute.xlu1 %350  ;;  %v346_v30 = vpop.permute.xlu0 %345 }
  0xa5   : > { %v412_v16 = vsub.f32 %v351_v29, %v1507_v36  ;;  %v413_v17 = vsub.f32 %v351_v29, %v1509_v37  ;;  %v410_v18 = vsub.f32 %v346_v30, %v1507_v36  ;;  %v411_v19 = vsub.f32 %v346_v30, %v1509_v37 }
  0xa6   : > { %v1585_v30 = vmul.f32 %v409_v13, %v409_v13 }
  0xa7   : > { %v1591_v35 = vmul.f32 %v412_v16, %v412_v16  ;;  %v1595_v40 = vmul.f32 %v410_v18, %v410_v18  ;;  %v1597_v42 = vmul.f32 %v411_v19, %v411_v19 }
  0xa8   : > { %v361_v33 = vpop.permute.xlu1 %360  ;;  %v356_v34 = vpop.permute.xlu0 %355 }
  0xa9   : > { %v416_v20 = vsub.f32 %v361_v33, %v1507_v36  ;;  %v417_v21 = vsub.f32 %v361_v33, %v1509_v37  ;;  %v414_v22 = vsub.f32 %v356_v34, %v1507_v36  ;;  %v415_v23 = vsub.f32 %v356_v34, %v1509_v37 }
  0xaa   : > { %v1589_v33 = vmul.f32 %v407_v15, %v407_v15  ;;  %v1593_v34 = vmul.f32 %v413_v17, %v413_v17 }
  0xab   : > { %v1601_v43 = vmul.f32 %v417_v21, %v417_v21  ;;  %v1605_v44 = vmul.f32 %v415_v23, %v415_v23 }
  0xac   : > { %v371_v38 = vpop.permute.xlu1 %370  ;;  %v366_v39 = vpop.permute.xlu0 %365 }
  0xad   : > { %v420_v26 = vsub.f32 %v371_v38, %v1507_v36  ;;  %v421_v27 = vsub.f32 %v371_v38, %v1509_v37  ;;  %v418_v28 = vsub.f32 %v366_v39, %v1507_v36  ;;  %v419_v29 = vsub.f32 %v366_v39, %v1509_v37 }
  0xae   : > { %v1599_v38 = vmul.f32 %v416_v20, %v416_v20  ;;  %v1603_v39 = vmul.f32 %v414_v22, %v414_v22 }
  0xaf   : > { %v1607_v49 = vmul.f32 %v420_v26, %v420_v26  ;;  %v1609_v50 = vmul.f32 %v421_v27, %v421_v27  ;;  %v1611_v51 = vmul.f32 %v418_v28, %v418_v28  ;;  %v1613_v52 = vmul.f32 %v419_v29, %v419_v29 }
  0xb0   : > { %v1520_v46 = vpop.permute.xlu1 %380  ;;  %v1522_v47 = vpop.permute.xlu0 %375 }
  0xb1   : > { %v424_v53 = vsub.f32 %v1520_v46, %v1507_v36  ;;  %v425_v54 = vsub.f32 %v1520_v46, %v1509_v37  ;;  %v422_v55 = vsub.f32 %v1522_v47, %v1507_v36  ;;  %v423_v56 = vsub.f32 %v1522_v47, %v1509_v37 }
  0xb3   : > { %v1635_v21 = vmul.f32 %v424_v53, %v424_v53  ;;  %v1639_v22 = vmul.f32 %v422_v55, %v422_v55  ;;  %v1641_v23 = vmul.f32 %v423_v56, %v423_v56 }
  0xb5   : > { %v466_v6 = vpop.permute.xlu1 %465  ;;  %v462_v7 = vpop.permute.xlu0 %461  ;;  %2308 = vst [vmem:[#allocation6_spill] sm:$0xff] %v1635_v21 }
  0xb6   : > { %v537_v12 = vsub.f32 %v466_v6, %v1514_v41  ;;  %v538_v13 = vsub.f32 %v466_v6, %v1535_v57  ;;  %v535_v14 = vsub.f32 %v462_v7, %v1514_v41  ;;  %v536_v15 = vsub.f32 %v462_v7, %v1535_v57 }
  0xb7   : > { %v1637_v7 = vmul.f32 %v425_v54, %v425_v54 }
  0xb8   : > { %v567_v26 = vmul.f32 %v535_v14, %v535_v14  ;;  %v568_v27 = vmul.f32 %v536_v15, %v536_v15 }
  0xb9   : > { %v470_v24 = vpop.permute.xlu1 %469  ;;  %v474_v25 = vpop.permute.xlu0 %473 }
  0xba   : > { %v539_v16 = vsub.f32 %v470_v24, %v1514_v41  ;;  %v540_v17 = vsub.f32 %v470_v24, %v1535_v57  ;;  %v541_v46 = vsub.f32 %v474_v25, %v1514_v41  ;;  %v542_v18 = vsub.f32 %v474_v25, %v1535_v57 }
  0xbb   : > { %v569_v24 = vmul.f32 %v537_v12, %v537_v12  ;;  %v570_v25 = vmul.f32 %v538_v13, %v538_v13  ;;  %v1654_v15 = vadd.f32 %v567_v26, %v1547_v63 }
  0xbc   : > { %v571_v28 = vmul.f32 %v539_v16, %v539_v16  ;;  %v572_v29 = vmul.f32 %v540_v17, %v540_v17  ;;  %v573_v0 = vmul.f32 %v541_v46, %v541_v46  ;;  %v1657_v16 = vadd.f32 %v568_v27, %v1549_v1 }
  0xbd   : > { %v478_v45 = vpop.permute.xlu1 %477  ;;  %v482_v48 = vpop.permute.xlu0 %481  ;;  %v1648_v13 = vadd.f32 %v569_v24, %v1555_v4  ;;  %v1651_v14 = vadd.f32 %v570_v25, %v1557_v5 }
  0xbe   : > { %v543_v37 = vsub.f32 %v478_v45, %v1514_v41  ;;  %v544_v47 = vsub.f32 %v478_v45, %v1535_v57  ;;  %v545_v6 = vsub.f32 %v482_v48, %v1514_v41  ;;  %v546_v20 = vsub.f32 %v482_v48, %v1535_v57 }
  0xbf   : > { %v574_v45 = vmul.f32 %v542_v18, %v542_v18  ;;  %v1660_v17 = vadd.f32 %v571_v28, %v1543_v61  ;;  %v1663_v46 = vadd.f32 %v572_v29, %v1545_v62  ;;  %v1666_v18 = vadd.f32 %v573_v0, %v1551_v2 }
  0xc0   : > { %v575_v58 = vmul.f32 %v543_v37, %v543_v37  ;;  %v576_v48 = vmul.f32 %v544_v47, %v544_v47  ;;  %v577_v53 = vmul.f32 %v545_v6, %v545_v6  ;;  %v578_v21 = vmul.f32 %v546_v20, %v546_v20 }
  0xc1   : > { %v486_v36 = vpop.permute.xlu1 %485  ;;  %v490_v19 = vpop.permute.xlu0 %489  ;;  %v1669_v4 = vadd.f32 %v574_v45, %v1553_v3 }
  0xc2   : > { %v547_v54 = vsub.f32 %v486_v36, %v1514_v41  ;;  %v548_v55 = vsub.f32 %v486_v36, %v1535_v57  ;;  %v549_v56 = vsub.f32 %v490_v19, %v1514_v41  ;;  %v550_v12 = vsub.f32 %v490_v19, %v1535_v57 }
  0xc3   : > { %v1672_v63 = vadd.f32 %v575_v58, %v1563_v10  ;;  %v1675_v1 = vadd.f32 %v576_v48, %v1565_v11  ;;  %v1678_v61 = vadd.f32 %v577_v53, %v1559_v8  ;;  %v1681_v62 = vadd.f32 %v578_v21, %v1561_v9 }
  0xc4   : > { %v579_v19 = vmul.f32 %v547_v54, %v547_v54  ;;  %v580_v0 = vmul.f32 %v548_v55, %v548_v55  ;;  %v581_v2 = vmul.f32 %v549_v56, %v549_v56  ;;  %v582_v37 = vmul.f32 %v550_v12, %v550_v12 }
  0xc5   : > { %v494_v60 = vpop.permute.xlu1 %493  ;;  %v498_v59 = vpop.permute.xlu0 %497 }
  0xc6   : > { %v551_v3 = vsub.f32 %v494_v60, %v1514_v41  ;;  %v552_v47 = vsub.f32 %v494_v60, %v1535_v57  ;;  %v553_v58 = vsub.f32 %v498_v59, %v1514_v41  ;;  %v554_v10 = vsub.f32 %v498_v59, %v1535_v57 }
  0xc7   : > { %v1696_v59 = vadd.f32 %v579_v19, %v1587_v32  ;;  %v1699_v27 = vadd.f32 %v580_v0, %v1589_v33  ;;  %v1702_v28 = vadd.f32 %v581_v2, %v1583_v31  ;;  %v1705_v29 = vadd.f32 %v582_v37, %v1585_v30 }
  0xc8   : > { %v583_v45 = vmul.f32 %v551_v3, %v551_v3  ;;  %v584_v48 = vmul.f32 %v552_v47, %v552_v47  ;;  %v585_v53 = vmul.f32 %v553_v58, %v553_v58  ;;  %v586_v54 = vmul.f32 %v554_v10, %v554_v10 }
  0xc9   : > { %v502_v5 = vpop.permute.xlu1 %501  ;;  %v506_v36 = vpop.permute.xlu0 %505 }
  0xca   : > { %v555_v11 = vsub.f32 %v502_v5, %v1514_v41  ;;  %v556_v8 = vsub.f32 %v502_v5, %v1535_v57  ;;  %v557_v6 = vsub.f32 %v506_v36, %v1514_v41  ;;  %v558_v9 = vsub.f32 %v506_v36, %v1535_v57 }
  0xcb   : > { %v1712_v3 = vadd.f32 %v583_v45, %v1595_v40  ;;  %v1715_v47 = vadd.f32 %v584_v48, %v1597_v42  ;;  %v1718_v58 = vadd.f32 %v585_v53, %v1591_v35  ;;  %v1721_v10 = vadd.f32 %v586_v54, %v1593_v34  ;;  %v2311_v48 = vld [vmem:[#allocation6_spill] sm:$0xff] }
  0xcc   : > { %v587_v55 = vmul.f32 %v555_v11, %v555_v11  ;;  %v588_v56 = vmul.f32 %v556_v8, %v556_v8  ;;  %v589_v12 = vmul.f32 %v557_v6, %v557_v6  ;;  %v590_v5 = vmul.f32 %v558_v9, %v558_v9 }
  0xcd   : > { %v510_v20 = vpop.permute.xlu1 %509  ;;  %v514_v21 = vpop.permute.xlu0 %513 }
  0xce   : > { %v559_v24 = vsub.f32 %v510_v20, %v1514_v41  ;;  %v560_v25 = vsub.f32 %v510_v20, %v1535_v57  ;;  %v561_v60 = vsub.f32 %v514_v21, %v1514_v41  ;;  %v562_v26 = vsub.f32 %v514_v21, %v1535_v57 }
  0xcf   : > { %v1730_v40 = vadd.f32 %v589_v12, %v1599_v38  ;;  %v1733_v42 = vadd.f32 %v590_v5, %v1601_v43 }
  0xd0   : > { %v591_v19 = vmul.f32 %v559_v24, %v559_v24  ;;  %v592_v20 = vmul.f32 %v560_v25, %v560_v25  ;;  %v593_v33 = vmul.f32 %v561_v60, %v561_v60  ;;  %v594_v0 = vmul.f32 %v562_v26, %v562_v26  ;;  %v2309_v25 = vld [vmem:[#allocation3_spill] sm:$0xff]  ;;  %v2310_v60 = vld [vmem:[#allocation4_spill] sm:$0xff] }
  0xd1   : > { %v518_v36 = vpop.permute.xlu1 %517  ;;  %v522_v32 = vpop.permute.xlu0 %521 }
  0xd2   : > { %v563_v31 = vsub.f32 %v518_v36, %v1514_v41  ;;  %v564_v2 = vsub.f32 %v518_v36, %v1535_v57  ;;  %v565_v30 = vsub.f32 %v522_v32, %v1514_v41  ;;  %v566_v37 = vsub.f32 %v522_v32, %v1535_v57 }
  0xd3   : > { %v1724_v41 = vadd.f32 %v587_v55, %v1603_v39  ;;  %v1727_v57 = vadd.f32 %v588_v56, %v1605_v44  ;;  %v1736_v34 = vadd.f32 %v591_v19, %v1611_v51  ;;  %v1739_v24 = vadd.f32 %v592_v20, %v1613_v52 }
  0xd4   : > { %v595_v11 = vmul.f32 %v563_v31, %v563_v31  ;;  %v596_v8 = vmul.f32 %v564_v2, %v564_v2  ;;  %v597_v6 = vmul.f32 %v565_v30, %v565_v30  ;;  %v598_v9 = vmul.f32 %v566_v37, %v566_v37 }
  0xd5   : > { %v1742_v39 = vadd.f32 %v593_v33, %v1607_v49  ;;  %v1745_v44 = vadd.f32 %v594_v0, %v1609_v50 }
  0xd6   : > { %v635_v35 = vpop.permute.xlu1 %634  ;;  %v639_v21 = vpop.permute.xlu0 %638  ;;  %v1752_v51 = vadd.f32 %v595_v11, %v1639_v22  ;;  %v1755_v52 = vadd.f32 %v596_v8, %v1641_v23  ;;  %v1758_v49 = vadd.f32 %v597_v6, %v2311_v48  ;;  %v1761_v50 = vadd.f32 %v598_v9, %v1637_v7  ;;  %v2312_v8 = vld [vmem:[#allocation5_spill] sm:$0xff] }
  0xd7   : > { %v708_v38 = vsub.f32 %v635_v35, %v2309_v25  ;;  %v709_v26 = vsub.f32 %v635_v35, %v2310_v60  ;;  %v710_v43 = vsub.f32 %v639_v21, %v2309_v25  ;;  %v711_v45 = vsub.f32 %v639_v21, %v2310_v60 }
  0xd9   : > { %v740_v53 = vmul.f32 %v708_v38, %v708_v38  ;;  %v741_v54 = vmul.f32 %v709_v26, %v709_v26  ;;  %v742_v55 = vmul.f32 %v710_v43, %v710_v43  ;;  %v743_v56 = vmul.f32 %v711_v45, %v711_v45 }
  0xda   : > { %v643_v12 = vpop.permute.xlu1 %642  ;;  %v651_v5 = vpop.permute.xlu0 %650  ;;  %v2313_v38 = vmov 0  }
  0xdb   : > { %v712_v36 = vsub.f32 %v643_v12, %v2309_v25  ;;  %v713_v22 = vsub.f32 %v643_v12, %v2310_v60  ;;  %v716_v32 = vsub.f32 %v651_v5, %v2309_v25  ;;  %v717_v23 = vsub.f32 %v651_v5, %v2310_v60 }
  0xdc   : > { %v1768_v19 = vadd.f32 %v740_v53, %v1654_v15  ;;  %v1771_v7 = vadd.f32 %v741_v54, %v1657_v16  ;;  %v1774_v20 = vadd.f32 %v742_v55, %v1648_v13  ;;  %v1777_v33 = vadd.f32 %v743_v56, %v1651_v14 }
  0xdd   : > { %v744_v0 = vmul.f32 %v712_v36, %v712_v36  ;;  %v745_v31 = vmul.f32 %v713_v22, %v713_v22  ;;  %v748_v2 = vmul.f32 %v716_v32, %v716_v32  ;;  %v749_v30 = vmul.f32 %v717_v23, %v717_v23 }
  0xde   : > { %v647_v37 = vpop.permute.xlu1 %646  ;;  %v659_v11 = vpop.permute.xlu0 %658  ;;  %vm805_vm0 = vcmp.le.f32.partialorder %v1768_v19, %v2312_v8  ;;  %vm806_vm1 = vcmp.le.f32.partialorder %v1771_v7, %v2312_v8  ;;  %vm807_vm2 = vcmp.le.f32.partialorder %v1774_v20, %v2312_v8  ;;  %vm808_vm3 = vcmp.le.f32.partialorder %v1777_v33, %v2312_v8 }
  0xdf   : > { %v1788_v13 = vadd.f32 %v744_v0, %v1660_v17  ;;  %v1791_v14 = vadd.f32 %v745_v31, %v1663_v46  ;;  %v1794_v15 = vadd.f32 %v748_v2, %v1672_v63  ;;  %v1797_v16 = vadd.f32 %v749_v30, %v1675_v1  ;;  %vm1902_vm8 = vmpackc.low %vm808_vm3, %vm806_vm1 }
  0xe0   : > { %v714_v6 = vsub.f32 %v647_v37, %v2309_v25  ;;  %v715_v9 = vsub.f32 %v647_v37, %v2310_v60  ;;  %v720_v35 = vsub.f32 %v659_v11, %v2309_v25  ;;  %v721_v21 = vsub.f32 %v659_v11, %v2310_v60  ;;  %vm1917_vm9 = vmpackc.low %vm807_vm2, %vm805_vm0 }
  0xe1   : > { %v949_v17 = vsel %vm805_vm0, 1, %v2313_v38  ;;  %v950_v46 = vsel %vm806_vm1, 1, %v2313_v38  ;;  %v951_v63 = vsel %vm807_vm2, 1, %v2313_v38  ;;  %v952_v1 = vsel %vm808_vm3, 1, %v2313_v38 }
  0xe2   : > { %v746_v26 = vmul.f32 %v714_v6, %v714_v6  ;;  %v747_v43 = vmul.f32 %v715_v9, %v715_v9  ;;  %v752_v45 = vmul.f32 %v720_v35, %v720_v35  ;;  %v753_v48 = vmul.f32 %v721_v21, %v721_v21  ;;  %v655_v53 = vpop.permute.xlu1 %654  ;;  %v667_v54 = vpop.permute.xlu0 %666 }
  0xe3   : > { %v718_v55 = vsub.f32 %v655_v53, %v2309_v25  ;;  %v719_v56 = vsub.f32 %v655_v53, %v2310_v60  ;;  %v724_v12 = vsub.f32 %v667_v54, %v2309_v25  ;;  %v725_v5 = vsub.f32 %v667_v54, %v2310_v60 }
  0xe4   : > { %v1824_v36 = vadd.f32 %v746_v26, %v1666_v18  ;;  %v1827_v22 = vadd.f32 %v747_v43, %v1669_v4  ;;  %v1830_v32 = vadd.f32 %v752_v45, %v1696_v59  ;;  %v1833_v23 = vadd.f32 %v753_v48, %v1699_v27 }
  0xe5   : > { %v750_v0 = vmul.f32 %v718_v55, %v718_v55  ;;  %v751_v31 = vmul.f32 %v719_v56, %v719_v56  ;;  %v756_v2 = vmul.f32 %v724_v12, %v724_v12  ;;  %v757_v30 = vmul.f32 %v725_v5, %v725_v5 }
  0xe6   : > { %v1835_v37 = vadd.s32 %v950_v46, %v949_v17  ;;  %v1837_v11 = vadd.s32 %v952_v1, %v951_v63  ;;  %v663_v6 = vpop.permute.xlu1 %662  ;;  %v675_v18 = vpop.permute.xlu0 %674  ;;  %vm809_vm4 = vcmp.le.f32.partialorder %v1788_v13, %v2312_v8  ;;  %vm810_vm5 = vcmp.le.f32.partialorder %v1791_v14, %v2312_v8 }
  0xe7   : > { %v1844_v4 = vadd.f32 %v750_v0, %v1678_v61  ;;  %v1847_v59 = vadd.f32 %v751_v31, %v1681_v62  ;;  %v1850_v27 = vadd.f32 %v756_v2, %v1712_v3  ;;  %v1853_v9 = vadd.f32 %v757_v30, %v1715_v47 }
  0xe8   : > { %v983_v35 = vshrl.u32 %v1835_v37, 16  ;;  %v996_v21 = vshrl.u32 %v1837_v11, 16  ;;  %v722_v17 = vsub.f32 %v663_v6, %v2309_v25  ;;  %v723_v46 = vsub.f32 %v663_v6, %v2310_v60 }
  0xe9   : > { %v728_v61 = vsub.f32 %v675_v18, %v2309_v25  ;;  %v729_v63 = vsub.f32 %v675_v18, %v2310_v60  ;;  %v953_v62 = vsel %vm809_vm4, 1, %v2313_v38  ;;  %v954_v3 = vsel %vm810_vm5, 1, %v2313_v38 }
  0xea   : > { %v985_v47 = vcvt.s32.f32 %v983_v35  ;;  %v998_v1 = vcvt.s32.f32 %v996_v21  ;;  %v754_v26 = vmul.f32 %v722_v17, %v722_v17  ;;  %v755_v43 = vmul.f32 %v723_v46, %v723_v46  ;;  %v671_v54 = vpop.permute.xlu1 %670  ;;  %v683_v55 = vpop.permute.xlu0 %682 }
  0xeb   : > { %v760_v45 = vmul.f32 %v728_v61, %v728_v61  ;;  %v761_v48 = vmul.f32 %v729_v63, %v729_v63  ;;  %v1869_v53 = vadd.s32 %v954_v3, %v953_v62  ;;  %vm813_vm6 = vcmp.le.f32.partialorder %v1794_v15, %v2312_v8 }
  0xec   : > { %988 = vadd.xlane.f32.xlu0 %v985_v47  ;;  %1001 = vadd.xlane.f32.xlu1 %v998_v1  ;;  %v1874_v56 = vadd.f32 %v754_v26, %v1702_v28  ;;  %v1877_v12 = vadd.f32 %v755_v43, %v1705_v29  ;;  %vm814_vm7 = vcmp.le.f32.partialorder %v1797_v16, %v2312_v8  ;;  %v957_v5 = vsel %vm813_vm6, 1, %v2313_v38 }
  0xed   : > { %v1886_v0 = vadd.f32 %v760_v45, %v1724_v41  ;;  %v1889_v31 = vadd.f32 %v761_v48, %v1727_v57  ;;  %v1009_v28 = vshrl.u32 %v1869_v53, 16  ;;  %v958_v29 = vsel %vm814_vm7, 1, %v2313_v38 }
  0xee   : > { %v1906_v41 = vadd.s32 %v958_v29, %v957_v5  ;;  %v726_v57 = vsub.f32 %v671_v54, %v2309_v25  ;;  %v727_v30 = vsub.f32 %v671_v54, %v2310_v60  ;;  %v732_v6 = vsub.f32 %v683_v55, %v2309_v25  ;;  %v679_v48 = vpop.permute.xlu1 %678  ;;  %v691_v29 = vpop.permute.xlu0 %690 }
  0xef   : > { %v1011_v33 = vcvt.s32.f32 %v1009_v28  ;;  %v733_v18 = vsub.f32 %v683_v55, %v2310_v60  ;;  %vm811_vm10 = vcmp.le.f32.partialorder %v1824_v36, %v2312_v8  ;;  %vm812_vm11 = vcmp.le.f32.partialorder %v1827_v22, %v2312_v8 }
  0xf0   : > { %v1035_v35 = vshrl.u32 %v1906_v41, 16  ;;  %v758_v21 = vmul.f32 %v726_v57, %v726_v57  ;;  %v759_v19 = vmul.f32 %v727_v30, %v727_v30  ;;  %v764_v17 = vmul.f32 %v732_v6, %v732_v6  ;;  %vm1930_vm12 = vmpackc.low %vm812_vm11, %vm810_vm5 }
  0xf1   : > { %1014 = vadd.xlane.f32.xlu0 %v1011_v33  ;;  %v765_v46 = vmul.f32 %v733_v18, %v733_v18  ;;  %v955_v61 = vsel %vm811_vm10, 1, %v2313_v38  ;;  %v956_v36 = vsel %vm812_vm11, 1, %v2313_v38  ;;  %vm838_vm13 = vmpackc.low %vm811_vm10, %vm809_vm4  ;;  %vm817_vm14 = vcmp.le.f32.partialorder %v1830_v32, %v2312_v8 }
  0xf2   : > { %v1037_v22 = vcvt.s32.f32 %v1035_v35  ;;  %v1942_v14 = vadd.f32 %v758_v21, %v1718_v58  ;;  %v1945_v63 = vadd.f32 %v759_v19, %v1721_v10  ;;  %v1948_v62 = vadd.f32 %v764_v17, %v1736_v34  ;;  %vm839_vm15 = vmpackc.even %vm838_vm13, %vm1917_vm9 }
  0xf3   : > { %v1953_v13 = vadd.f32 %v765_v46, %v1739_v24  ;;  %v1955_v3 = vadd.s32 %v956_v36, %v955_v61  ;;  %vm842_vm0 = vmpackc.even %vm1930_vm12, %vm1902_vm8  ;;  %v861_v58 = vsel %vm839_vm15, 16843009, %v2313_v38  ;;  %vm818_vm1 = vcmp.le.f32.partialorder %v1833_v23, %v2312_v8 }
  0xf4   : > { %1040 = vadd.xlane.f32.xlu1 %v1037_v22  ;;  %v862_v10 = vsel %vm842_vm0, 16843009, %v2313_v38  ;;  %v869_v34 = vunpack.c.0.s8 %v861_v58  ;;  %v871_v47 = vunpack.c.1.s8 %v861_v58  ;;  %v873_v1 = vunpack.c.2.s8 %v861_v58 }
  0xf5   : > { %v1022_v24 = vshrl.u32 %v1955_v3, 16  ;;  %v870_v26 = vunpack.c.0.s8 %v862_v10  ;;  %v872_v43 = vunpack.c.1.s8 %v862_v10  ;;  %v874_v45 = vunpack.c.2.s8 %v862_v10 }
  0xf6   : > { %v875_v54 = vunpack.c.3.s8 %v861_v58  ;;  %v876_v55 = vunpack.c.3.s8 %v862_v10  ;;  %v961_v5 = vsel %vm817_vm14, 1, %v2313_v38  ;;  %v962_v28 = vsel %vm818_vm1, 1, %v2313_v38 }
  0xf7   : > { %v1024_v2 = vcvt.s32.f32 %v1022_v24  ;;  %v901_v57 = vpack.c.b16 %v870_v26, %v869_v34  ;;  %v903_v30 = vpack.c.b16 %v872_v43, %v871_v47  ;;  %v905_v6 = vpack.c.b16 %v874_v45, %v873_v1  ;;  %v687_v34 = vpop.permute.xlu1 %686 }
  0xf8   : > { %v907_v7 = vpack.c.b16 %v876_v55, %v875_v54  ;;  %v1980_v33 = vadd.s32 %v962_v28, %v961_v5  ;;  %v730_v18 = vsub.f32 %v679_v48, %v2309_v25  ;;  %v731_v35 = vsub.f32 %v679_v48, %v2310_v60 }
  0xf9   : > { %1027 = vadd.xlane.f32.xlu0 %v1024_v2  ;;  %v902_v21 = vpack.c.b8 %v901_v57, %v901_v57  ;;  %v904_v19 = vpack.c.b8 %v903_v30, %v903_v30  ;;  %v906_v17 = vpack.c.b8 %v905_v6, %v905_v6  ;;  %v736_v20 = vsub.f32 %v691_v29, %v2309_v25 }
  0xfa   : > { %v908_v46 = vpack.c.b8 %v907_v7, %v907_v7  ;;  %v1061_v61 = vshrl.u32 %v1980_v33, 16  ;;  %v762_v36 = vmul.f32 %v730_v18, %v730_v18  ;;  %v763_v22 = vmul.f32 %v731_v35, %v731_v35 }
  0xfb   : > { %933 = vst [vmem:[%s1978_s9] sm:$0xf] %v902_v21  ;;  %934 = vst [vmem:[%s1978_s9 + $0x4] sm:$0xf] %v904_v19  ;;  %v737_v58 = vsub.f32 %v691_v29, %v2310_v60  ;;  %v768_v10 = vmul.f32 %v736_v20, %v736_v20  ;;  %vm815_vm2 = vcmp.le.f32.partialorder %v1844_v4, %v2312_v8  ;;  %v695_v35 = vpop.permute.xlu1 %694 }
  0xfc   : > { %935 = vst [vmem:[%s1978_s9 + $0x8] sm:$0xf] %v906_v17  ;;  %vm816_vm3 = vcmp.le.f32.partialorder %v1847_v59, %v2312_v8  ;;  %936 = vst [vmem:[%s1978_s9 + $0xc] sm:$0xf] %v908_v46  ;;  %v1063_v47 = vcvt.s32.f32 %v1061_v61  ;;  %v1996_v1 = vadd.f32 %v762_v36, %v1730_v40  ;;  %v1999_v24 = vadd.f32 %v763_v22, %v1733_v42 }
  0xfd   : > { %v959_v26 = vsel %vm815_vm2, 1, %v2313_v38  ;;  %v769_v43 = vmul.f32 %v737_v58, %v737_v58  ;;  %v2003_v45 = vadd.f32 %v768_v10, %v1752_v51  ;;  %v960_v4 = vsel %vm816_vm3, 1, %v2313_v38  ;;  %vm2016_vm5 = vmpackc.low %vm815_vm2, %vm813_vm6 }
  0xfe   : > { %vm821_vm4 = vcmp.le.f32.partialorder %v1850_v27, %v2312_v8  ;;  %1066 = vadd.xlane.f32.xlu1 %v1063_v47  ;;  %v2011_v40 = vadd.s32 %v960_v4, %v959_v26  ;;  %vm822_vm8 = vcmp.le.f32.partialorder %v1853_v9, %v2312_v8  ;;  %v734_v48 = vsub.f32 %v687_v34, %v2309_v25  ;;  %vm2036_vm6 = vmpackc.low %vm816_vm3, %vm814_vm7 }
  0xff   : > { %v965_v51 = vsel %vm821_vm4, 1, %v2313_v38  ;;  %v2028_v54 = vadd.f32 %v769_v43, %v1755_v52  ;;  %v966_v55 = vsel %vm822_vm8, 1, %v2313_v38  ;;  %v735_v5 = vsub.f32 %v687_v34, %v2310_v60 }
 0x100   : > { %vm819_vm9 = vcmp.le.f32.partialorder %v1874_v56, %v2312_v8  ;;  %v1048_v52 = vshrl.u32 %v2011_v40, 16  ;;  %v2048_v16 = vadd.s32 %v966_v55, %v965_v51  ;;  %v766_v28 = vmul.f32 %v734_v48, %v734_v48 }
 0x101   : > { %vm820_vm7 = vcmp.le.f32.partialorder %v1877_v12, %v2312_v8  ;;  %vm844_vm10 = vmpackc.low %vm819_vm9, %vm817_vm14  ;;  %v767_v59 = vmul.f32 %v735_v5, %v735_v5  ;;  %v963_v29 = vsel %vm819_vm9, 1, %v2313_v38  ;;  %vm825_vm12 = vcmp.le.f32.partialorder %v1886_v0, %v2312_v8 }
 0x102   : > { %v964_v2 = vsel %vm820_vm7, 1, %v2313_v38  ;;  %vm845_vm11 = vmpackc.even %vm844_vm10, %vm2016_vm5  ;;  %v1050_v56 = vcvt.s32.f32 %v1048_v52  ;;  %v1087_v57 = vshrl.u32 %v2048_v16, 16  ;;  %v2063_v12 = vadd.f32 %v766_v28, %v1742_v39 }
 0x103   : > { %v2065_v30 = vadd.s32 %v964_v2, %v963_v29  ;;  %vm847_vm13 = vmpackc.low %vm820_vm7, %vm818_vm1  ;;  %v2071_v32 = vadd.f32 %v767_v59, %v1745_v44  ;;  %v863_v6 = vsel %vm845_vm11, 16843009, %v2313_v38  ;;  %vm826_vm15 = vcmp.le.f32.partialorder %v1889_v31, %v2312_v8 }
 0x104   : > { %vm848_vm14 = vmpackc.even %vm847_vm13, %vm2036_vm6  ;;  %v969_v39 = vsel %vm825_vm12, 1, %v2313_v38  ;;  %1053 = vadd.xlane.f32.xlu0 %v1050_v56  ;;  %v1089_v7 = vcvt.s32.f32 %v1087_v57  ;;  %v877_v18 = vunpack.c.0.s8 %v863_v6  ;;  %v879_v19 = vunpack.c.1.s8 %v863_v6 }
 0x105   : > { %v1074_v23 = vshrl.u32 %v2065_v30, 16  ;;  %v864_v44 = vsel %vm848_vm14, 16843009, %v2313_v38  ;;  %v881_v20 = vunpack.c.2.s8 %v863_v6  ;;  %v883_v36 = vunpack.c.3.s8 %v863_v6 }
 0x106   : > { %v878_v21 = vunpack.c.0.s8 %v864_v44  ;;  %v880_v17 = vunpack.c.1.s8 %v864_v44  ;;  %1092 = vadd.xlane.f32.xlu1 %v1089_v7  ;;  %v882_v61 = vunpack.c.2.s8 %v864_v44  ;;  %v884_v22 = vunpack.c.3.s8 %v864_v44 }
 0x107   : > { %v1076_v46 = vcvt.s32.f32 %v1074_v23  ;;  %v970_v34 = vsel %vm826_vm15, 1, %v2313_v38  ;;  %v738_v47 = vsub.f32 %v695_v35, %v2309_v25  ;;  %v739_v42 = vsub.f32 %v695_v35, %v2310_v60 }
 0x108   : > { %v909_v58 = vpack.c.b16 %v878_v21, %v877_v18  ;;  %v911_v10 = vpack.c.b16 %v880_v17, %v879_v19  ;;  %v913_v26 = vpack.c.b16 %v882_v61, %v881_v20  ;;  %v915_v43 = vpack.c.b16 %v884_v22, %v883_v36 }
 0x109   : > { %1079 = vadd.xlane.f32.xlu0 %v1076_v46  ;;  %v2089_v4 = vadd.s32 %v970_v34, %v969_v39  ;;  %v770_v15 = vmul.f32 %v738_v47, %v738_v47  ;;  %vm823_vm0 = vcmp.le.f32.partialorder %v1942_v14, %v2312_v8  ;;  %v771_v52 = vmul.f32 %v739_v42, %v739_v42 }
 0x10a   : > { %v910_v51 = vpack.c.b8 %v909_v58, %v909_v58  ;;  %v912_v48 = vpack.c.b8 %v911_v10, %v911_v10  ;;  %v914_v55 = vpack.c.b8 %v913_v26, %v913_v26  ;;  %v916_v5 = vpack.c.b8 %v915_v43, %v915_v43  ;;  %vm2098_vm1 = vmpackc.low %vm823_vm0, %vm821_vm4 }
 0x10b   : > { %v1113_v25 = vshrl.u32 %v2089_v4, 16  ;;  %v2105_v60 = vadd.f32 %v770_v15, %v1758_v49  ;;  %vm824_vm2 = vcmp.le.f32.partialorder %v1945_v63, %v2312_v8  ;;  %v967_v14 = vsel %vm823_vm0, 1, %v2313_v38 }
 0x10c   : > { %937 = vst [vmem:[%s1978_s9 + $0x10] sm:$0xf] %v910_v51  ;;  %938 = vst [vmem:[%s1978_s9 + $0x14] sm:$0xf] %v912_v48  ;;  %vm829_vm3 = vcmp.le.f32.partialorder %v1948_v62, %v2312_v8  ;;  %v2115_v59 = vadd.f32 %v771_v52, %v1761_v50  ;;  %v968_v29 = vsel %vm824_vm2, 1, %v2313_v38  ;;  %vm830_vm5 = vcmp.le.f32.partialorder %v1953_v13, %v2312_v8 }
 0x10d   : > { %939 = vst [vmem:[%s1978_s9 + $0x18] sm:$0xf] %v914_v55  ;;  %940 = vst [vmem:[%s1978_s9 + $0x1c] sm:$0xf] %v916_v5  ;;  %v1115_v27 = vcvt.s32.f32 %v1113_v25  ;;  %v2127_v63 = vadd.s32 %v968_v29, %v967_v14  ;;  %v973_v50 = vsel %vm829_vm3, 1, %v2313_v38  ;;  %v974_v2 = vsel %vm830_vm5, 1, %v2313_v38 }
 0x10e   : > { %vm2121_vm4 = vmpackc.low %vm824_vm2, %vm822_vm8  ;;  %vm827_vm8 = vcmp.le.f32.partialorder %v1996_v1, %v2312_v8  ;;  %v2139_v9 = vadd.s32 %v974_v2, %v973_v50  ;;  %vm828_vm6 = vcmp.le.f32.partialorder %v1999_v24, %v2312_v8  ;;  %vm833_vm7 = vcmp.le.f32.partialorder %v2003_v45, %v2312_v8 }
 0x10f   : > { %1118 = vadd.xlane.f32.xlu1 %v1115_v27  ;;  %v971_v56 = vsel %vm827_vm8, 1, %v2313_v38  ;;  %vm850_vm9 = vmpackc.low %vm827_vm8, %vm825_vm12  ;;  %v1100_v57 = vshrl.u32 %v2127_v63, 16  ;;  %v972_v6 = vsel %vm828_vm6, 1, %v2313_v38  ;;  %vm834_vm11 = vcmp.le.f32.partialorder %v2028_v54, %v2312_v8 }
 0x110   : > { %vm851_vm10 = vmpackc.even %vm850_vm9, %vm2098_vm1  ;;  %v977_v1 = vsel %vm833_vm7, 1, %v2313_v38  ;;  %v1139_v0 = vshrl.u32 %v2139_v9, 16  ;;  %v2160_v24 = vadd.s32 %v972_v6, %v971_v56  ;;  %v978_v7 = vsel %vm834_vm11, 1, %v2313_v38 }
 0x111   : > { %vm853_vm12 = vmpackc.low %vm828_vm6, %vm826_vm15  ;;  %v865_v39 = vsel %vm851_vm10, 16843009, %v2313_v38  ;;  %v1102_v23 = vcvt.s32.f32 %v1100_v57  ;;  %v2174_v58 = vadd.s32 %v978_v7, %v977_v1  ;;  %vm831_vm14 = vcmp.le.f32.partialorder %v2063_v12, %v2312_v8 }
 0x112   : > { %vm854_vm13 = vmpackc.even %vm853_vm12, %vm2121_vm4  ;;  %v885_v44 = vunpack.c.0.s8 %v865_v39  ;;  %v887_v18 = vunpack.c.1.s8 %v865_v39  ;;  %v889_v35 = vunpack.c.2.s8 %v865_v39  ;;  %v1141_v21 = vcvt.s32.f32 %v1139_v0 }
 0x113   : > { %v1126_v19 = vshrl.u32 %v2160_v24, 16  ;;  %v866_v31 = vsel %vm854_vm13, 16843009, %v2313_v38  ;;  %v891_v17 = vunpack.c.3.s8 %v865_v39  ;;  %1105 = vadd.xlane.f32.xlu0 %v1102_v23  ;;  %vm832_vm15 = vcmp.le.f32.partialorder %v2071_v32, %v2312_v8  ;;  %vm2183_vm0 = vmpackc.low %vm831_vm14, %vm829_vm3 }
 0x114   : > { %v886_v20 = vunpack.c.0.s8 %v866_v31  ;;  %v888_v46 = vunpack.c.1.s8 %v866_v31  ;;  %v890_v61 = vunpack.c.2.s8 %v866_v31  ;;  %v892_v36 = vunpack.c.3.s8 %v866_v31  ;;  %1144 = vadd.xlane.f32.xlu1 %v1141_v21  ;;  %vm2193_vm1 = vmpackc.low %vm832_vm15, %vm830_vm5 }
 0x115   : > { %v1128_v22 = vcvt.s32.f32 %v1126_v19  ;;  %v1165_v42 = vshrl.u32 %v2174_v58, 16  ;;  %v975_v12 = vsel %vm831_vm14, 1, %v2313_v38  ;;  %v976_v32 = vsel %vm832_vm15, 1, %v2313_v38 }
 0x116   : > { %v917_v10 = vpack.c.b16 %v886_v20, %v885_v44  ;;  %v919_v34 = vpack.c.b16 %v888_v46, %v887_v18  ;;  %v921_v47 = vpack.c.b16 %v890_v61, %v889_v35  ;;  %v923_v26 = vpack.c.b16 %v892_v36, %v891_v17 }
 0x117   : > { %v982_v62 = vand.u32 65535, %v1835_v37  ;;  %1131 = vadd.xlane.f32.xlu0 %v1128_v22  ;;  %v1167_v25 = vcvt.s32.f32 %v1165_v42  ;;  %v2198_v52 = vadd.s32 %v976_v32, %v975_v12  ;;  %vm835_vm2 = vcmp.le.f32.partialorder %v2105_v60, %v2312_v8 }
 0x118   : > { %v918_v48 = vpack.c.b8 %v917_v10, %v917_v10  ;;  %v920_v15 = vpack.c.b8 %v919_v34, %v919_v34  ;;  %v922_v55 = vpack.c.b8 %v921_v47, %v921_v47  ;;  %v924_v5 = vpack.c.b8 %v923_v26, %v923_v26  ;;  %vm856_vm4 = vmpackc.low %vm835_vm2, %vm833_vm7 }
 0x119   : > { %vm836_vm3 = vcmp.le.f32.partialorder %v2115_v59, %v2312_v8  ;;  %v979_v37 = vsel %vm835_vm2, 1, %v2313_v38  ;;  %1170 = vadd.xlane.f32.xlu1 %v1167_v25  ;;  %v1152_v13 = vshrl.u32 %v2198_v52, 16  ;;  %vm857_vm5 = vmpackc.even %vm856_vm4, %vm2183_vm0  ;;  %v984_v60 = vcvt.s32.f32 %v982_v62 }
 0x11a   : > { %941 = vst [vmem:[%s1978_s9 + $0x20] sm:$0xf] %v918_v48  ;;  %942 = vst [vmem:[%s1978_s9 + $0x24] sm:$0xf] %v920_v15  ;;  %v980_v28 = vsel %vm836_vm3, 1, %v2313_v38  ;;  %v1008_v57 = vand.u32 65535, %v1869_v53 }
 0x11b   : > { %943 = vst [vmem:[%s1978_s9 + $0x28] sm:$0xf] %v922_v55  ;;  %944 = vst [vmem:[%s1978_s9 + $0x2c] sm:$0xf] %v924_v5  ;;  %v2216_v14 = vadd.s32 %v980_v28, %v979_v37  ;;  %v867_v27 = vsel %vm857_vm5, 16843009, %v2313_v38  ;;  %v1154_v59 = vcvt.s32.f32 %v1152_v13 }
 0x11c   : > { %vm859_vm8 = vmpackc.low %vm836_vm3, %vm834_vm11  ;;  %v893_v45 = vunpack.c.0.s8 %v867_v27  ;;  %v895_v29 = vunpack.c.1.s8 %v867_v27  ;;  %v897_v49 = vunpack.c.2.s8 %v867_v27  ;;  %v899_v56 = vunpack.c.3.s8 %v867_v27 }
 0x11d   : > { %vm860_vm6 = vmpackc.even %vm859_vm8, %vm2193_vm1  ;;  %v1178_v50 = vshrl.u32 %v2216_v14, 16  ;;  %1157 = vadd.xlane.f32.xlu0 %v1154_v59  ;;  %986 = vadd.xlane.f32.xlu1 %v984_v60  ;;  %v995_v39 = vand.u32 65535, %v1837_v11  ;;  %v1010_v18 = vcvt.s32.f32 %v1008_v57  ;;  %v1034_v53 = vand.u32 65535, %v1906_v41 }
 0x11e   : > { %v868_v2 = vsel %vm860_vm6, 16843009, %v2313_v38  ;;  %v1021_v11 = vand.u32 65535, %v1955_v3  ;;  %v1060_v46 = vand.u32 65535, %v1980_v33  ;;  %v1047_v41 = vand.u32 65535, %v2011_v40 }
 0x11f   : > { %v894_v8 = vunpack.c.0.s8 %v868_v2  ;;  %v896_v54 = vunpack.c.1.s8 %v868_v2  ;;  %v898_v6 = vunpack.c.2.s8 %v868_v2  ;;  %v900_v1 = vunpack.c.3.s8 %v868_v2 }
 0x120   : > { %v1180_v0 = vcvt.s32.f32 %v1178_v50  ;;  %v997_v17 = vcvt.s32.f32 %v995_v39  ;;  %v1036_v20 = vcvt.s32.f32 %v1034_v53  ;;  %v1023_v61 = vcvt.s32.f32 %v1021_v11 }
 0x121   : > { %v925_v7 = vpack.c.b16 %v894_v8, %v893_v45  ;;  %v927_v23 = vpack.c.b16 %v896_v54, %v895_v29  ;;  %v929_v44 = vpack.c.b16 %v898_v6, %v897_v49  ;;  %v931_v38 = vpack.c.b16 %v900_v1, %v899_v56  ;;  %1012 = vadd.xlane.f32.xlu1 %v1010_v18 }
 0x122   : > { %1183 = vadd.xlane.f32.xlu0 %v1180_v0  ;;  %v1062_v36 = vcvt.s32.f32 %v1060_v46  ;;  %v1086_v22 = vand.u32 65535, %v2048_v16  ;;  %v1049_v10 = vcvt.s32.f32 %v1047_v41  ;;  %v1073_v34 = vand.u32 65535, %v2065_v30 }
 0x123   : > { %v926_v35 = vpack.c.b8 %v925_v7, %v925_v7  ;;  %v928_v21 = vpack.c.b8 %v927_v23, %v927_v23  ;;  %v930_v19 = vpack.c.b8 %v929_v44, %v929_v44  ;;  %v932_v31 = vpack.c.b8 %v931_v38, %v931_v38 }
 0x124   : > { %v1088_v47 = vcvt.s32.f32 %v1086_v22  ;;  %v1112_v26 = vand.u32 65535, %v2089_v4  ;;  %v1075_v3 = vcvt.s32.f32 %v1073_v34  ;;  %v1099_v33 = vand.u32 65535, %v2127_v63 }
 0x125   : > { %945 = vst [vmem:[%s1978_s9 + $0x30] sm:$0xf] %v926_v35  ;;  %946 = vst [vmem:[%s1978_s9 + $0x34] sm:$0xf] %v928_v21  ;;  %1038 = vadd.xlane.f32.xlu1 %v1036_v20  ;;  %v1138_v42 = vand.u32 65535, %v2139_v9  ;;  %v1125_v16 = vand.u32 65535, %v2160_v24 }
 0x126   : > { %947 = vst [vmem:[%s1978_s9 + $0x38] sm:$0xf] %v930_v19  ;;  %948 = vst [vmem:[%s1978_s9 + $0x3c] sm:$0xf] %v932_v31  ;;  %999 = vadd.xlane.f32.xlu0 %v997_v17  ;;  %v1114_v43 = vcvt.s32.f32 %v1112_v26  ;;  %v1101_v40 = vcvt.s32.f32 %v1099_v33  ;;  %v1164_v32 = vand.u32 65535, %v2174_v58  ;;  %v1151_v4 = vand.u32 65535, %v2198_v52 }
 0x127   : > { %v1140_v12 = vcvt.s32.f32 %v1138_v42  ;;  %v1127_v30 = vcvt.s32.f32 %v1125_v16  ;;  %v1177_v62 = vand.u32 65535, %v2216_v14 }
 0x128   : > { %v1166_v51 = vcvt.s32.f32 %v1164_v32  ;;  %v1153_v63 = vcvt.s32.f32 %v1151_v4 }
 0x129   : > { %1064 = vadd.xlane.f32.xlu1 %v1062_v36  ;;  %v1179_v9 = vcvt.s32.f32 %v1177_v62 }
 0x12a   : > { %1025 = vadd.xlane.f32.xlu0 %v1023_v61 }
 0x12d   : > { %1090 = vadd.xlane.f32.xlu1 %v1088_v47 }
 0x12e   : > { %1051 = vadd.xlane.f32.xlu0 %v1049_v10 }
 0x131   : > { %1116 = vadd.xlane.f32.xlu1 %v1114_v43 }
 0x132   : > { %1077 = vadd.xlane.f32.xlu0 %v1075_v3 }
 0x135   : > { %1142 = vadd.xlane.f32.xlu1 %v1140_v12 }
 0x136   : > { %1103 = vadd.xlane.f32.xlu0 %v1101_v40 }
 0x139   : > { %1168 = vadd.xlane.f32.xlu1 %v1166_v51 }
 0x13a   : > { %1129 = vadd.xlane.f32.xlu0 %v1127_v30 }
 0x13e   : > { %1155 = vadd.xlane.f32.xlu0 %v1153_v63 }
 0x142   : > { %1181 = vadd.xlane.f32.xlu0 %v1179_v9 }
 0x179   : > { %v989_v48 = vpop.xlane.xlu0 %988  ;;  %v1002_v15 = vpop.xlane.xlu1 %1001 }
 0x17a   : > { %v991_v59 = vcvt.f32.s32 %v989_v48  ;;  %v1004_v8 = vcvt.f32.s32 %v1002_v15 }
 0x17c   : > { %v992_v49 = vshll.u32 %v991_v59, 16  ;;  %v1005_v23 = vshll.u32 %v1004_v8, 16 }
 0x17e   : > { %v1015_v24 = vpop.xlane.xlu0 %1014 }
 0x17f   : > { %v1017_v2 = vcvt.f32.s32 %v1015_v24 }
 0x181   : > { %v1041_v55 = vpop.xlane.xlu1 %1040  ;;  %v1018_v1 = vshll.u32 %v1017_v2, 16 }
 0x182   : > { %v1043_v6 = vcvt.f32.s32 %v1041_v55 }
 0x184   : > { %v1044_v53 = vshll.u32 %v1043_v6, 16 }
 0x186   : > { %v1028_v5 = vpop.xlane.xlu0 %1027 }
 0x187   : > { %v1030_v44 = vcvt.f32.s32 %v1028_v5 }
 0x189   : > { %v1031_v11 = vshll.u32 %v1030_v44, 16 }
 0x18b   : > { %v1067_v58 = vpop.xlane.xlu1 %1066 }
 0x18c   : > { %v1069_v35 = vcvt.f32.s32 %v1067_v58 }
 0x18e   : > { %v1070_v41 = vshll.u32 %v1069_v35, 16 }
 0x191   : > { %v1054_v25 = vpop.xlane.xlu0 %1053 }
 0x192   : > { %v1056_v20 = vcvt.f32.s32 %v1054_v25 }
 0x193   : > { %v1093_v37 = vpop.xlane.xlu1 %1092 }
 0x194   : > { %v1095_v36 = vcvt.f32.s32 %v1093_v37  ;;  %v1057_v26 = vshll.u32 %v1056_v20, 16 }
 0x196   : > { %v1080_v13 = vpop.xlane.xlu0 %1079  ;;  %v1096_v42 = vshll.u32 %v1095_v36, 16 }
 0x197   : > { %v1082_v3 = vcvt.f32.s32 %v1080_v13 }
 0x199   : > { %v1083_v4 = vshll.u32 %v1082_v3, 16 }
 0x19c   : > { %v1119_v52 = vpop.xlane.xlu1 %1118 }
 0x19d   : > { %v1121_v40 = vcvt.f32.s32 %v1119_v52 }
 0x19f   : > { %v1122_v9 = vshll.u32 %v1121_v40, 16 }
 0x1a0   : > { %v2245_v28 = vpop.xlane.xlu0 %1105 }
 0x1a1   : > { %v2247_v60 = vpop.xlane.xlu1 %1144  ;;  %v1108_v51 = vcvt.f32.s32 %v2245_v28 }
 0x1a2   : > { %v1147_v48 = vcvt.f32.s32 %v2247_v60 }
 0x1a3   : > { %v1109_v58 = vshll.u32 %v1108_v51, 16 }
 0x1a4   : > { %v2249_v27 = vpop.xlane.xlu0 %1131  ;;  %v1148_v52 = vshll.u32 %v1147_v48, 16 }
 0x1a5   : > { %v1134_v25 = vcvt.f32.s32 %v2249_v27 }
 0x1a6   : > { %v2251_v14 = vpop.xlane.xlu1 %1170 }
 0x1a7   : > { %v1173_v28 = vcvt.f32.s32 %v2251_v14 }
 0x1a9   : > { %v1174_v8 = vshll.u32 %v1173_v28, 16 }
 0x1aa   : > { %v987_v45 = vpop.xlane.xlu1 %986  ;;  %v2253_v29 = vpop.xlane.xlu0 %1157 }
 0x1ab   : > { %v990_v50 = vcvt.f32.s32 %v987_v45  ;;  %v1160_v2 = vcvt.f32.s32 %v2253_v29 }
 0x1ad   : > { %v993_v56 = vadd.s32 %v992_v49, %v990_v50  ;;  %v1135_v50 = vshll.u32 %v1134_v25, 16 }
 0x1ae   : > { %v1013_v54 = vpop.xlane.xlu1 %1012 }
 0x1af   : > { %v2262_v57 = vpop.xlane.xlu0 %1183  ;;  %v1016_v0 = vcvt.f32.s32 %v1013_v54  ;;  %1221 = vst [vmem:[%s2260_s12] sm:$0xff] %v993_v56 }
 0x1b1   : > { %v1019_v39 = vadd.s32 %v1018_v1, %v1016_v0  ;;  %v1161_v0 = vshll.u32 %v1160_v2, 16 }
 0x1b2   : > { %v1039_v38 = vpop.xlane.xlu1 %1038 }
 0x1b3   : > { %v1000_v7 = vpop.xlane.xlu0 %999  ;;  %v1042_v21 = vcvt.f32.s32 %v1039_v38  ;;  %1223 = vst [vmem:[%s2260_s12 + $0x10] sm:$0xff] %v1019_v39  ;;  %v1186_v39 = vcvt.f32.s32 %v2262_v57 }
 0x1b4   : > { %v1003_v18 = vcvt.f32.s32 %v1000_v7 }
 0x1b5   : > { %v1045_v31 = vadd.s32 %v1044_v53, %v1042_v21  ;;  %v1187_v29 = vshll.u32 %v1186_v39, 16 }
 0x1b6   : > { %v1006_v19 = vadd.s32 %v1005_v23, %v1003_v18  ;;  %v1065_v46 = vpop.xlane.xlu1 %1064 }
 0x1b7   : > { %v1026_v17 = vpop.xlane.xlu0 %1025  ;;  %v1068_v22 = vcvt.f32.s32 %v1065_v46  ;;  %1225 = vst [vmem:[%s2260_s12 + $0x20] sm:$0xff] %v1045_v31 }
 0x1b8   : > { %v1029_v61 = vcvt.f32.s32 %v1026_v17  ;;  %1222 = vst [vmem:[%s2260_s12 + $0x8] sm:$0xff] %v1006_v19 }
 0x1b9   : > { %v1071_v34 = vadd.s32 %v1070_v41, %v1068_v22 }
 0x1ba   : > { %v1032_v10 = vadd.s32 %v1031_v11, %v1029_v61  ;;  %v1091_v33 = vpop.xlane.xlu1 %1090 }
 0x1bb   : > { %v1052_v47 = vpop.xlane.xlu0 %1051  ;;  %v1094_v16 = vcvt.f32.s32 %v1091_v33  ;;  %1227 = vst [vmem:[%s2260_s12 + $0x30] sm:$0xff] %v1071_v34 }
 0x1bc   : > { %v1055_v43 = vcvt.f32.s32 %v1052_v47  ;;  %1224 = vst [vmem:[%s2260_s12 + $0x18] sm:$0xff] %v1032_v10 }
 0x1bd   : > { %v1097_v32 = vadd.s32 %v1096_v42, %v1094_v16 }
 0x1be   : > { %v1058_v12 = vadd.s32 %v1057_v26, %v1055_v43  ;;  %v1117_v63 = vpop.xlane.xlu1 %1116 }
 0x1bf   : > { %v1078_v30 = vpop.xlane.xlu0 %1077  ;;  %v1120_v15 = vcvt.f32.s32 %v1117_v63  ;;  %1229 = vst [vmem:[%s2260_s12 + $0x40] sm:$0xff] %v1097_v32 }
 0x1c0   : > { %v1081_v62 = vcvt.f32.s32 %v1078_v30  ;;  %1226 = vst [vmem:[%s2260_s12 + $0x28] sm:$0xff] %v1058_v12 }
 0x1c1   : > { %v1123_v55 = vadd.s32 %v1122_v9, %v1120_v15 }
 0x1c2   : > { %v1084_v24 = vadd.s32 %v1083_v4, %v1081_v62  ;;  %v1143_v37 = vpop.xlane.xlu1 %1142 }
 0x1c3   : > { %v1104_v5 = vpop.xlane.xlu0 %1103  ;;  %v1146_v59 = vcvt.f32.s32 %v1143_v37  ;;  %1231 = vst [vmem:[%s2260_s12 + $0x50] sm:$0xff] %v1123_v55 }
 0x1c4   : > { %v1107_v13 = vcvt.f32.s32 %v1104_v5  ;;  %1228 = vst [vmem:[%s2260_s12 + $0x38] sm:$0xff] %v1084_v24 }
 0x1c5   : > { %v1149_v45 = vadd.s32 %v1148_v52, %v1146_v59 }
 0x1c6   : > { %v1110_v60 = vadd.s32 %v1109_v58, %v1107_v13  ;;  %v1169_v56 = vpop.xlane.xlu1 %1168 }
 0x1c7   : > { %v1130_v49 = vpop.xlane.xlu0 %1129  ;;  %v1172_v54 = vcvt.f32.s32 %v1169_v56  ;;  %1233 = vst [vmem:[%s2260_s12 + $0x60] sm:$0xff] %v1149_v45 }
 0x1c8   : > { %v1133_v27 = vcvt.f32.s32 %v1130_v49  ;;  %1230 = vst [vmem:[%s2260_s12 + $0x48] sm:$0xff] %v1110_v60 }
 0x1c9   : > { %v1175_v14 = vadd.s32 %v1174_v8, %v1172_v54 }
 0x1ca   : > { %v1136_v6 = vadd.s32 %v1135_v50, %v1133_v27 }
 0x1cb   : > { %v1156_v1 = vpop.xlane.xlu0 %1155  ;;  %1235 = vst [vmem:[%s2260_s12 + $0x70] sm:$0xff] %v1175_v14 }
 0x1cc   : > { %v1159_v7 = vcvt.f32.s32 %v1156_v1  ;;  %1232 = vst [vmem:[%s2260_s12 + $0x58] sm:$0xff] %v1136_v6 }
 0x1ce   : > { %v1162_v23 = vadd.s32 %v1161_v0, %v1159_v7 }
 0x1cf   : > { %v1182_v44 = vpop.xlane.xlu0 %1181 }
 0x1d0   : > { %v1185_v38 = vcvt.f32.s32 %v1182_v44  ;;  %1234 = vst [vmem:[%s2260_s12 + $0x68] sm:$0xff] %v1162_v23 }
 0x1d2   : > { %v1188_v18 = vadd.s32 %v1187_v29, %v1185_v38 }
 0x1d4   : > { %1236 = vst [vmem:[%s2260_s12 + $0x78] sm:$0xff] %v1188_v18 }
 0x1d5 PF: > { %s16_s19 = sadd.s32 1, %s1443_s19   ;;  %s2332_s17 = smov %s1439_s18 }
 0x1d6   : > { %p13_p5 = scmp.ge.s32.totalorder %s16_s19, 4   ;;  %s2333_s18 = smov %s2335_s0 }
 0x1d8   :  { %15 = sbr.rel (!%p13_p5) target bundleno = 2 (0x2), region = 83 }

</bundles_post_ra>
